<compile_context>
chip_gen: v7x
topology: tpu7x:2x2x1
jax: 0.10.0
libtpu: 0.0.40
codegen_flags: <defaults>
</compile_context>

<pallas_src>
import math

import jax
import jax.numpy as jnp
from jax.experimental import pallas as pl
from jax.experimental.pallas import tpu as pltpu

LANE = 128  # TPU lane width; hidden dim padded to this for lane-dense layouts.


def _round_up(x, m):
    return (x + m - 1) // m * m


def _ppo_kernel(x_ref, w1_ref, w2_ref, wh_ref, b_ref, out_ref):
    h_pad = w1_ref.shape[1]
    out_cols = wh_ref.shape[1]

    # shared layer 1: x @ W1 + b1, ReLU  (cast to weight dtype in-kernel; the
    # bias add / ReLU stay in f32)
    x = x_ref[...].astype(w1_ref.dtype)
    h1 = jnp.dot(x, w1_ref[...], preferred_element_type=jnp.float32)
    h1 = jnp.maximum(h1 + b_ref[0:1, :h_pad], 0.0)

    # shared layer 2: h1 @ W2 + b2, ReLU
    h2 = jnp.dot(h1.astype(w2_ref.dtype), w2_ref[...],
                 preferred_element_type=jnp.float32)
    h2 = jnp.maximum(h2 + b_ref[1:2, :h_pad], 0.0)

    # fused policy+value head: one narrow matmul, (tile_b, out_cols) store.
    out = jnp.dot(h2.astype(wh_ref.dtype), wh_ref[...],
                  preferred_element_type=jnp.float32)
    out_ref[...] = (out + b_ref[2:3, :out_cols]).astype(out_ref.dtype)


def pack_params(params, compute_dtype=jnp.bfloat16):
    """Wrapper-side layout prep: pad hidden dim to 128, fuse the two heads into
    one [H_pad, OUT_cols] matrix (OUT_cols = round_up(action_dim+1, 8)), bundle
    the biases into one (3, cols) f32 tensor.  Zero padding is a mathematical
    no-op through bias + ReLU."""
    w1, b1 = params["w1"], params["b1"]
    w2, b2 = params["w2"], params["b2"]
    wp, bp = params["wp"], params["bp"]
    wv, bv = params["wv"], params["bv"]

    state_dim, hidden = w1.shape
    action_dim = wp.shape[1]
    h_pad = _round_up(hidden, LANE)
    out_cols = _round_up(action_dim + 1, 8)
    b_cols = max(h_pad, out_cols)

    w1p = jnp.zeros((state_dim, h_pad), jnp.float32).at[:, :hidden].set(w1)
    w2p = jnp.zeros((h_pad, h_pad), jnp.float32).at[:hidden, :hidden].set(w2)
    whp = (jnp.zeros((h_pad, out_cols), jnp.float32)
           .at[:hidden, :action_dim].set(wp)
           .at[:hidden, action_dim].set(wv[:, 0]))
    biases = (jnp.zeros((3, b_cols), jnp.float32)
              .at[0, :hidden].set(b1[0])
              .at[1, :hidden].set(b2[0])
              .at[2, :action_dim].set(bp[0])
              .at[2, action_dim].set(bv[0, 0]))

    return {
        "w1": w1p.astype(compute_dtype),
        "w2": w2p.astype(compute_dtype),
        "wh": whp.astype(compute_dtype),
        "b": biases,  # biases stay f32 (elementwise path)
    }


def ppo_forward(state, params, *, compute_dtype=jnp.bfloat16, max_tile_b=2048):
    """state: [B, state_dim] float32; params: raw PPONetwork params
    (weights stored [in, out], biases [1, out]).  Returns (logits, value)."""
    B, state_dim = state.shape
    hidden = params["w1"].shape[1]
    action_dim = params["wp"].shape[1]
    h_pad = _round_up(hidden, LANE)
    out_cols = _round_up(action_dim + 1, 8)

    packed = pack_params(params, compute_dtype)

    # Batch tiling: biggest (8-aligned) tile up to max_tile_b.  No wrapper-side
    # pad copy: grid uses cdiv and Pallas clips the partial last block (rows are
    # independent, so garbage rows past B never affect valid rows).
    max_tile_b = max(8, (max_tile_b // 8) * 8)
    tile_b = min(max_tile_b, _round_up(B, 8))
    # Guarantee >= 2 grid steps when possible so ("parallel",) can shard the
    # batch axis across v7x's two TensorCores (free on v5e/v6e).
    if B > 8 and pl.cdiv(B, tile_b) < 2:
        tile_b = max(8, _round_up(pl.cdiv(B, 2), 8))
    grid = (pl.cdiv(B, tile_b),)

    # Rough VMEM footprint: double-buffered streams + resident weights +
    # compiler temporaries for h1/h2/out (each (tile_b, 128) f32).
    w_bytes = jnp.dtype(compute_dtype).itemsize
    weights_bytes = ((packed["w1"].size + packed["w2"].size + packed["wh"].size)
                     * w_bytes + packed["b"].size * 4)
    est_vmem = (2 * weights_bytes
                + 2 * tile_b * state_dim * 4
                + 2 * tile_b * out_cols * 4
                + 3 * tile_b * h_pad * 4)
    vmem_limit = None
    if est_vmem > 12 * 1024 * 1024:
        # keep comfortably under v7x's 64 MiB physical VMEM
        vmem_limit = int(min(max(2 * est_vmem, 32 * 1024 * 1024),
                             56 * 1024 * 1024))

    cost = pl.CostEstimate(
        flops=2 * B * (state_dim * h_pad + h_pad * h_pad + h_pad * out_cols),
        transcendentals=0,
        bytes_accessed=int(B * state_dim * 4 + B * out_cols * 4 + weights_bytes),
    )

    kernel = pl.pallas_call(
        _ppo_kernel,
        out_shape=jax.ShapeDtypeStruct((B, out_cols), jnp.float32),
        grid_spec=pltpu.PrefetchScalarGridSpec(
            num_scalar_prefetch=0,
            grid=grid,
            in_specs=[
                # streamed activations: new tile per grid step
                pl.BlockSpec((tile_b, state_dim), lambda i: (i, 0)),
                # weights/biases: same block every step -> stay resident in VMEM
                pl.BlockSpec((state_dim, h_pad), lambda i: (0, 0)),
                pl.BlockSpec((h_pad, h_pad), lambda i: (0, 0)),
                pl.BlockSpec((h_pad, out_cols), lambda i: (0, 0)),
                pl.BlockSpec(packed["b"].shape, lambda i: (0, 0)),
            ],
            out_specs=pl.BlockSpec((tile_b, out_cols), lambda i: (i, 0)),
        ),
        compiler_params=pltpu.CompilerParams(
            dimension_semantics=("parallel",),
            vmem_limit_bytes=vmem_limit),
        cost_estimate=cost,
    )
    out = kernel(state, packed["w1"], packed["w2"], packed["wh"], packed["b"])

    logits = out[:, :action_dim]
    value = out[:, action_dim:action_dim + 1]
    return logits, value


def init_ppo_params(key, state_dim, action_dim, hidden_dim=32):
    """Deterministic init mirroring nn.Linear's U(-1/sqrt(fan_in), 1/sqrt(fan_in)).
    Weights stored [in, out]; biases [1, out]."""
    keys = jax.random.split(key, 8)

    def linear(kw, kb, fan_in, fan_out):
        bound = 1.0 / math.sqrt(fan_in)
        w = jax.random.uniform(kw, (fan_in, fan_out), jnp.float32, -bound, bound)
        b = jax.random.uniform(kb, (1, fan_out), jnp.float32, -bound, bound)
        return w, b

    w1, b1 = linear(keys[0], keys[1], state_dim, hidden_dim)
    w2, b2 = linear(keys[2], keys[3], hidden_dim, hidden_dim)
    wp, bp = linear(keys[4], keys[5], hidden_dim, action_dim)
    wv, bv = linear(keys[6], keys[7], hidden_dim, 1)
    return {"w1": w1, "b1": b1, "w2": w2, "b2": b2,
            "wp": wp, "bp": bp, "wv": wv, "bv": bv}


def ppo_forward_ref(state, params):
    """Pure-JAX reference for correctness checking."""
    h1 = jnp.maximum(state @ params["w1"] + params["b1"], 0.0)
    h2 = jnp.maximum(h1 @ params["w2"] + params["b2"], 0.0)
    logits = h2 @ params["wp"] + params["bp"]
    value = h2 @ params["wv"] + params["bv"]
    return logits, value


if __name__ == "__main__":
    key = jax.random.PRNGKey(0)
    k_params, k_state, k_big = jax.random.split(key, 3)

    batch = 8
    state_dim = 8
    action_dim = 4
    hidden_dim = 32

    params = init_ppo_params(k_params, state_dim, action_dim, hidden_dim)
    state = jax.random.normal(k_state, (batch, state_dim), dtype=jnp.float32)
    ref_logits, ref_value = ppo_forward_ref(state, params)

    # f32 compute path: exact match against the reference (single grid step).
    logits, value = ppo_forward(state, params, compute_dtype=jnp.float32)
    jax.block_until_ready((logits, value))
    assert logits.shape == (batch, action_dim)
    assert value.shape == (batch, 1)
    assert jnp.allclose(logits, ref_logits, atol=1e-5, rtol=1e-5)
    assert jnp.allclose(value, ref_value, atol=1e-5, rtol=1e-5)

    # Default bf16-weight path on a larger, non-tile-aligned batch: exercises
    # the multi-step grid, the partial (clipped) last block, resident weights,
    # and the narrow output slab.  Mixed-precision drift -> looser tolerance.
    big_b = 300
    big_state = jax.random.normal(k_big, (big_b, state_dim), dtype=jnp.float32)
    big_logits, big_value = ppo_forward(big_state, params, max_tile_b=128)
    jax.block_until_ready((big_logits, big_value))
    ref_bl, ref_bv = ppo_forward_ref(big_state, params)
    assert big_logits.shape == (big_b, action_dim)
    assert big_value.shape == (big_b, 1)
    assert jnp.allclose(big_logits, ref_bl, atol=5e-2, rtol=5e-2)
    assert jnp.allclose(big_value, ref_bv, atol=5e-2, rtol=5e-2)

    print("KERNEL_OK")
</pallas_src>

<mosaic_0001>
module attributes {stable_mosaic.version = 11 : i64} {
  func.func @_ppo_kernel(%arg0: i32, %arg1: memref<8x8xf32, #tpu.memory_space<vmem>>, %arg2: memref<8x128xf32, #tpu.memory_space<vmem>>, %arg3: memref<128x128xf32, #tpu.memory_space<vmem>>, %arg4: memref<128x8xf32, #tpu.memory_space<vmem>>, %arg5: memref<3x128xf32, #tpu.memory_space<vmem>>, %arg6: memref<8x8xf32, #tpu.memory_space<vmem>>) attributes {dimension_semantics = [#tpu.dimension_semantics<parallel>], iteration_bounds = array<i64: 1>, scalar_prefetch = 0 : i64, scratch_operands = 0 : i64, tpu.core_type = #tpu.core_type<tc>, window_params = [{transform_indices = @transform_0, window_bounds = array<i64: 8, 8>}, {pipeline_mode = #tpu.pipeline_mode<synchronous>, transform_indices = @transform_1, window_bounds = array<i64: 8, 128>}, {pipeline_mode = #tpu.pipeline_mode<synchronous>, transform_indices = @transform_2, window_bounds = array<i64: 128, 128>}, {pipeline_mode = #tpu.pipeline_mode<synchronous>, transform_indices = @transform_3, window_bounds = array<i64: 128, 8>}, {pipeline_mode = #tpu.pipeline_mode<synchronous>, transform_indices = @transform_4, window_bounds = array<i64: 3, 128>}, {transform_indices = @transform_5, window_bounds = array<i64: 8, 8>}]} {
    %c0 = arith.constant 0 : index
    %c0_0 = arith.constant 0 : index
    %0 = vector.load %arg1[%c0, %c0_0] : memref<8x8xf32, #tpu.memory_space<vmem>>, vector<8x8xf32>
    %c0_1 = arith.constant 0 : index
    %c0_2 = arith.constant 0 : index
    %1 = vector.load %arg2[%c0_1, %c0_2] : memref<8x128xf32, #tpu.memory_space<vmem>>, vector<8x128xf32>
    %cst = arith.constant dense<0.000000e+00> : vector<8x128xf32>
    %2 = tpu.matmul %0, %1, %cst {dimension_numbers = #tpu.dot_dimension_numbers<[1], [0], [0], [1], [0, 0, 1, 1], [], []>} : vector<8x8xf32>, vector<8x128xf32>, vector<8x128xf32> -> vector<8x128xf32>
    %c0_3 = arith.constant 0 : index
    %c0_4 = arith.constant 0 : index
    %3 = vector.load %arg5[%c0_3, %c0_4] : memref<3x128xf32, #tpu.memory_space<vmem>>, vector<1x128xf32>
    %4 = vector.broadcast %3 : vector<1x128xf32> to vector<8x128xf32>
    %5 = arith.addf %2, %4 : vector<8x128xf32>
    %cst_5 = arith.constant 0.000000e+00 : f32
    %6 = vector.broadcast %cst_5 : f32 to vector<8x128xf32>
    %7 = arith.maximumf %5, %6 : vector<8x128xf32>
    %c0_6 = arith.constant 0 : index
    %c0_7 = arith.constant 0 : index
    %8 = vector.load %arg3[%c0_6, %c0_7] : memref<128x128xf32, #tpu.memory_space<vmem>>, vector<128x128xf32>
    %cst_8 = arith.constant dense<0.000000e+00> : vector<8x128xf32>
    %9 = tpu.matmul %7, %8, %cst_8 {dimension_numbers = #tpu.dot_dimension_numbers<[1], [0], [0], [1], [0, 0, 1, 1], [], []>} : vector<8x128xf32>, vector<128x128xf32>, vector<8x128xf32> -> vector<8x128xf32>
    %c1 = arith.constant 1 : index
    %c0_9 = arith.constant 0 : index
    %10 = vector.load %arg5[%c1, %c0_9] : memref<3x128xf32, #tpu.memory_space<vmem>>, vector<1x128xf32>
    %11 = vector.broadcast %10 : vector<1x128xf32> to vector<8x128xf32>
    %12 = arith.addf %9, %11 : vector<8x128xf32>
    %cst_10 = arith.constant 0.000000e+00 : f32
    %13 = vector.broadcast %cst_10 : f32 to vector<8x128xf32>
    %14 = arith.maximumf %12, %13 : vector<8x128xf32>
    %c0_11 = arith.constant 0 : index
    %c0_12 = arith.constant 0 : index
    %15 = vector.load %arg4[%c0_11, %c0_12] : memref<128x8xf32, #tpu.memory_space<vmem>>, vector<128x8xf32>
    %cst_13 = arith.constant dense<0.000000e+00> : vector<8x8xf32>
    %16 = tpu.matmul %14, %15, %cst_13 {dimension_numbers = #tpu.dot_dimension_numbers<[1], [0], [0], [1], [0, 0, 1, 1], [], []>} : vector<8x128xf32>, vector<128x8xf32>, vector<8x8xf32> -> vector<8x8xf32>
    %c2 = arith.constant 2 : index
    %c0_14 = arith.constant 0 : index
    %17 = vector.load %arg5[%c2, %c0_14] : memref<3x128xf32, #tpu.memory_space<vmem>>, vector<1x8xf32>
    %18 = vector.broadcast %17 : vector<1x8xf32> to vector<8x8xf32>
    %19 = arith.addf %16, %18 : vector<8x8xf32>
    %c0_15 = arith.constant 0 : index
    %c0_16 = arith.constant 0 : index
    %20 = vector.load %arg6[%c0_15, %c0_16] : memref<8x8xf32, #tpu.memory_space<vmem>>, vector<8x8xf32>
    tpu.vector_store %arg6[%c0_15, %c0_16], %19 {strides = array<i32>} : memref<8x8xf32, #tpu.memory_space<vmem>>, vector<8x8xf32>,
    return
  }
  func.func @transform_0(%arg0: i32) -> (i32, i32) {
    %c0_i32 = arith.constant 0 : i32
    %c0_i32_0 = arith.constant 0 : i32
    return %arg0, %c0_i32 : i32, i32
  }
  func.func @transform_1(%arg0: i32) -> (i32, i32) {
    %c0_i32 = arith.constant 0 : i32
    %c0_i32_0 = arith.constant 0 : i32
    %c0_i32_1 = arith.constant 0 : i32
    return %c0_i32, %c0_i32_0 : i32, i32
  }
  func.func @transform_2(%arg0: i32) -> (i32, i32) {
    %c0_i32 = arith.constant 0 : i32
    %c0_i32_0 = arith.constant 0 : i32
    %c0_i32_1 = arith.constant 0 : i32
    return %c0_i32, %c0_i32_0 : i32, i32
  }
  func.func @transform_3(%arg0: i32) -> (i32, i32) {
    %c0_i32 = arith.constant 0 : i32
    %c0_i32_0 = arith.constant 0 : i32
    %c0_i32_1 = arith.constant 0 : i32
    return %c0_i32, %c0_i32_0 : i32, i32
  }
  func.func @transform_4(%arg0: i32) -> (i32, i32) {
    %c0_i32 = arith.constant 0 : i32
    %c0_i32_0 = arith.constant 0 : i32
    %c0_i32_1 = arith.constant 0 : i32
    return %c0_i32, %c0_i32_0 : i32, i32
  }
  func.func @transform_5(%arg0: i32) -> (i32, i32) {
    %c0_i32 = arith.constant 0 : i32
    %c0_i32_0 = arith.constant 0 : i32
    return %arg0, %c0_i32 : i32, i32
  }
}

</mosaic_0001>

<bundles_post_ra>
// kernel: tpu_custom_call.1
= control target key start
LH: loop header
LB: loop body
LE: loop exit
PB: predicated region body
PF: predicated region fallthrough
CT: control target
= control target key end

     0   :  { %10 = vsyncpa [#allocation3], 0  ;;  %s718_s0 = inlined_call_operand.vmem [shape: f32[8,8], index: 0, kind: input, shape index: {}]   ;;  %s719_s1 = inlined_call_operand.hbm [shape: f32[8,128], index: 1, kind: input, shape index: {}]   ;;  %s720_s2 = inlined_call_operand.vmem [shape: f32[128,128], index: 2, kind: input, shape index: {}]   ;;  %s721_s3 = inlined_call_operand.vmem [shape: f32[128,8], index: 3, kind: input, shape index: {}]   ;;  %s722_s4 = inlined_call_operand.vmem [shape: f32[3,128], index: 4, kind: input, shape index: {}]   ;;  %s723_s5 = inlined_call_operand.hbm [shape: f32[8,8], index: 5, kind: output, shape index: {}]  }
   0x1   :  { %11 = vsyncpa [#allocation4], 0  ;;  %s530_s18 = smov [#allocation2]   ;;  %s482_s22 = scalar_lea.hbm %s719_s1, 128 }
   0x2   :  { %s20_s19 = sshll.u32 %s530_s18, 4  ;;  %p483_p0 = scmp.ne.s32.totalorder %s719_s1, %s482_s22  ;;  %s21_s19 = int_to_ptr.vmem [resolvable:$true] %s20_s19 }
   0x3   :  { %p486_p1 = scmp.lt.u32.totalorder %s482_s22, %s719_s1 }
   0x5   :  { %p488_p2 = pnand %p486_p1, %p483_p0 }
   0x7   :  { %491 = shalt.err (!%p488_p2)
}
   0x8   :  { %s492_s27 = scalar_lea.vmem %s21_s19, 128  ;;  %p497_p4 = scmp.lt.s32.totalorder %s21_s19, %s21_s19 }
   0x9   :  { %p493_p3 = scmp.ne.s32.totalorder %s21_s19, %s492_s27  ;;  %p498_p5 = scmp.lt.s32.totalorder %s492_s27, %s492_s27 }
   0xb   :  { %p499_p6 = por %p498_p5, %p497_p4 }
   0xd   :  { %p500_p7 = pnand %p499_p6, %p493_p3 }
   0xf   :  { %503 = shalt.err (!%p500_p7)
}
  0x10   :  { %23 = dma.hbm_to_vmem [thread:$0]  %s719_s1, 128, %s21_s19, [#allocation3]  }
  0x11   :  { %526 = dma.done.wait [#allocation3], 128  }
  0x12   :  { %527 = vsyncadd [#allocation3], 4294967168  ;;  %v531_v0 = vmov 0.0   ;;  %vm532_vm0 = vmmov 0   ;;  %v533_v1 = vmov 0.0|0.0   ;;  %vm40_vm1 = vcmask 64512  }
  0x13   :  { %354 = vmatprep.subr.mxu0 %v531_v0  ;;  %356 = vmatprep.mubr.msk.f32.mxu0 %vm532_vm0, %v531_v0  ;;  %v34_v2 = vld [vmem:[#allocation2] sm:$0xff]  ;;  %v116_v5 = vld [vmem:[%s720_s2 + $0x8] sm:$0xff]  ;;  %v117_v6 = vld [vmem:[%s720_s2 + $0x10] sm:$0xff]  ;;  %s534_s19 = smov [#allocation5]  }
  0x14   :  { %429 = vmatprep.subr.bf16.mxu1 %v533_v1  ;;  %391 = vmatprep.mubr.msk.f32.mxu1 %vm532_vm0, %v531_v0  ;;  %v33_v3 = vld [vmem:[%s718_s0] sm:$0xff]  ;;  %v118_v7 = vld [vmem:[%s720_s2 + $0x18] sm:$0xff]  ;;  %v120_v11 = vld [vmem:[%s720_s2 + $0x28] sm:$0xff]  ;;  %s305_s20 = sshll.u32 %s534_s19, 4  ;;  %s306_s20 = int_to_ptr.vmem [resolvable:$true] %s305_s20 }
  0x15   :  { %v115_v4 = vld [vmem:[%s720_s2] sm:$0xff]  ;;  %355 = vmatpush3.msra.mxu0 %v34_v2  ;;  %v433_v9 = vpack.c.bf16 %v118_v7, %v117_v6  ;;  %v121_v13 = vld [vmem:[%s720_s2 + $0x30] sm:$0xff]  ;;  %v122_v14 = vld [vmem:[%s720_s2 + $0x38] sm:$0xff]  ;;  %p509_p9 = scmp.lt.s32.totalorder %s306_s20, %s306_s20 }
  0x16   :  { %357 = vmatmul.mubr.msk.f32.vlgmr.msra.gmra.mrb[0].mxu0 %vm40_vm1, %v33_v3  ;;  %v430_v8 = vpack.c.bf16 %v116_v5, %v115_v4  ;;  %453 = vmatprep.subr.bf16.mxu0 %v533_v1  ;;  %v119_v10 = vld [vmem:[%s720_s2 + $0x20] sm:$0xff]  ;;  %v439_v15 = vpack.c.bf16 %v122_v14, %v121_v13  ;;  %v124_v17 = vld [vmem:[%s720_s2 + $0x48] sm:$0xff]  ;;  %v125_v19 = vld [vmem:[%s720_s2 + $0x50] sm:$0xff] }
  0x17   :  { %426 = vmatprep.mubr.msk.f32.mxu0 %vm532_vm0, %v531_v0  ;;  %v436_v12 = vpack.c.bf16 %v120_v11, %v119_v10  ;;  %v123_v16 = vld [vmem:[%s720_s2 + $0x40] sm:$0xff]  ;;  %v126_v20 = vld [vmem:[%s720_s2 + $0x58] sm:$0xff]  ;;  %v128_v23 = vld [vmem:[%s720_s2 + $0x68] sm:$0xff] }
  0x18   :  { %431 = vmatpush3.bf16.msra.mxu1 %v430_v8  ;;  %v442_v18 = vpack.c.bf16 %v124_v17, %v123_v16  ;;  %v445_v21 = vpack.c.bf16 %v126_v20, %v125_v19  ;;  %v127_v22 = vld [vmem:[%s720_s2 + $0x60] sm:$0xff]  ;;  %v129_v25 = vld [vmem:[%s720_s2 + $0x70] sm:$0xff]  ;;  %v130_v26 = vld [vmem:[%s720_s2 + $0x78] sm:$0xff] }
  0x19   :  { %432 = vmatprep.subr.bf16.mxu1 %v533_v1  ;;  %v448_v24 = vpack.c.bf16 %v128_v23, %v127_v22  ;;  %v451_v27 = vpack.c.bf16 %v130_v26, %v129_v25  ;;  %v207_v28 = vld [vmem:[%s721_s3] sm:$0xff]  ;;  %v208_v29 = vld [vmem:[%s721_s3 + $0x8] sm:$0xff]  ;;  %v209_v30 = vld [vmem:[%s721_s3 + $0x10] sm:$0xff] }
  0x1a   :  { %v454_v31 = vpack.c.bf16 %v208_v29, %v207_v28  ;;  %v210_v32 = vld [vmem:[%s721_s3 + $0x18] sm:$0xff]  ;;  %v211_v34 = vld [vmem:[%s721_s3 + $0x20] sm:$0xff]  ;;  %v212_v35 = vld [vmem:[%s721_s3 + $0x28] sm:$0xff] }
  0x1b   :  { %v457_v33 = vpack.c.bf16 %v210_v32, %v209_v30  ;;  %v460_v36 = vpack.c.bf16 %v212_v35, %v211_v34  ;;  %v213_v37 = vld [vmem:[%s721_s3 + $0x30] sm:$0xff]  ;;  %v214_v38 = vld [vmem:[%s721_s3 + $0x38] sm:$0xff]  ;;  %v215_v40 = vld [vmem:[%s721_s3 + $0x40] sm:$0xff] }
  0x1c   :  { %434 = vmatpush3.bf16.msra.mxu1 %v433_v9  ;;  %455 = vmatpush3.bf16.msra.mxu0 %v454_v31  ;;  %v463_v39 = vpack.c.bf16 %v214_v38, %v213_v37  ;;  %v216_v41 = vld [vmem:[%s721_s3 + $0x48] sm:$0xff]  ;;  %v217_v43 = vld [vmem:[%s721_s3 + $0x50] sm:$0xff]  ;;  %v218_v44 = vld [vmem:[%s721_s3 + $0x58] sm:$0xff] }
  0x1d   :  { %435 = vmatprep.subr.bf16.mxu1 %v533_v1  ;;  %456 = vmatprep.subr.bf16.mxu0 %v533_v1  ;;  %v466_v42 = vpack.c.bf16 %v216_v41, %v215_v40  ;;  %v469_v45 = vpack.c.bf16 %v218_v44, %v217_v43  ;;  %v219_v46 = vld [vmem:[%s721_s3 + $0x60] sm:$0xff]  ;;  %v220_v47 = vld [vmem:[%s721_s3 + $0x68] sm:$0xff]  ;;  %v221_v54 = vld [vmem:[%s721_s3 + $0x70] sm:$0xff] }
  0x1e   :  { %v472_v48 = vpack.c.bf16 %v220_v47, %v219_v46  ;;  %v314_v49 = vld [vmem:[%s722_s4] ss:$0 sm:$0xff]  ;;  %v222_v55 = vld [vmem:[%s721_s3 + $0x78] sm:$0xff]  ;;  %v316_v57 = vld [vmem:[%s722_s4 + $0x1] ss:$0 sm:$0xff]  ;;  %s504_s3 = scalar_lea.vmem %s306_s20, 128 }
  0x1f   :  { %v475_v56 = vpack.c.bf16 %v222_v55, %v221_v54  ;;  %v317_v62 = vld [vmem:[%s722_s4 + $0x2] ss:$0 sm:$0xff]  ;;  %p505_p8 = scmp.ne.s32.totalorder %s306_s20, %s504_s3  ;;  %p510_p10 = scmp.lt.s32.totalorder %s504_s3, %s504_s3 }
  0x20   :  { %437 = vmatpush3.bf16.msra.mxu1 %v436_v12  ;;  %458 = vmatpush3.bf16.msra.mxu0 %v457_v33 }
  0x21   :  { %438 = vmatprep.subr.bf16.mxu1 %v533_v1  ;;  %459 = vmatprep.subr.bf16.mxu0 %v533_v1  ;;  %p511_p11 = por %p510_p10, %p509_p9 }
  0x23   :  { %p512_p12 = pnand %p511_p11, %p505_p8 }
  0x24   :  { %440 = vmatpush3.bf16.msra.mxu1 %v439_v15  ;;  %461 = vmatpush3.bf16.msra.mxu0 %v460_v36 }
  0x25   :  { %441 = vmatprep.subr.bf16.mxu1 %v533_v1  ;;  %462 = vmatprep.subr.bf16.mxu0 %v533_v1 }
  0x28   :  { %443 = vmatpush3.bf16.msra.mxu1 %v442_v18  ;;  %464 = vmatpush3.bf16.msra.mxu0 %v463_v39 }
  0x29   :  { %444 = vmatprep.subr.bf16.mxu1 %v533_v1  ;;  %465 = vmatprep.subr.bf16.mxu0 %v533_v1 }
  0x2c   :  { %446 = vmatpush3.bf16.msra.mxu1 %v445_v21  ;;  %467 = vmatpush3.bf16.msra.mxu0 %v466_v42 }
  0x2d   :  { %447 = vmatprep.subr.bf16.mxu1 %v533_v1  ;;  %468 = vmatprep.subr.bf16.mxu0 %v533_v1 }
  0x30   :  { %449 = vmatpush3.bf16.msra.mxu1 %v448_v24  ;;  %470 = vmatpush3.bf16.msra.mxu0 %v469_v45 }
  0x31   :  { %450 = vmatprep.subr.bf16.mxu1 %v533_v1  ;;  %471 = vmatprep.subr.bf16.mxu0 %v533_v1 }
  0x34   :  { %452 = vmatpush3.bf16.msra.mxu1 %v451_v27  ;;  %473 = vmatpush3.bf16.msra.mxu0 %v472_v48 }
  0x35   :  { %474 = vmatprep.subr.bf16.mxu0 %v533_v1 }
  0x38   :  { %476 = vmatpush3.bf16.msra.mxu0 %v475_v56 }
  0xe9   :  { %v110_v50 = vpop.f32.mrb[0].mxu0 }
  0xea   :  { %v111_v51 = vadd.f32 %v314_v49, %v110_v50  ;;  %v358_v52 = vpop.f32.mrb[1].mxu0 }
  0xec   :  { %v114_v53 = vmax.f32 %v111_v51, 0.0 }
  0xee   :  { %392 = vmatmul.mubr.f32.vlgmr.msra.gmra.mrb[0].mxu1 %v114_v53 }
 0x1c1   :  { %v202_v58 = vpop.f32.mrb[0].mxu1 }
 0x1c2   :  { %v203_v59 = vadd.f32 %v316_v57, %v202_v58  ;;  %v393_v60 = vpop.f32.mrb[1].mxu1 }
 0x1c4   :  { %v206_v61 = vmax.f32 %v203_v59, 0.0 }
 0x1c6   :  { %427 = vmatmul.mubr.f32.vlgmr.msra.gmra.mrb[2].mxu0 %v206_v61 }
 0x299   :  { %v294_v63 = vpop.f32.mrb[2].mxu0 }
 0x29a   :  { %v295_v0 = vadd.f32 %v317_v62, %v294_v63  ;;  %v428_v1 = vpop.f32.mrb[3].mxu0 }
 0x29c   :  { %298 = vst.msk [vmem:[#allocation5] sm:$0xff] %vm40_vm1, %v295_v0 }
 0x29d   :  { %515 = shalt.err (!%p512_p12)
}
 0x29e   :  { %s516_s23 = scalar_lea.hbm %s723_s5, 128 }
 0x29f   :  { %p517_p13 = scmp.ne.s32.totalorder %s723_s5, %s516_s23  ;;  %p520_p0 = scmp.lt.u32.totalorder %s516_s23, %s723_s5 }
 0x2a1   :  { %p522_p1 = pnand %p520_p0, %p517_p13 }
 0x2a3   :  { %525 = shalt.err (!%p522_p1)
}
 0x2a4   :  { %308 = dma.vmem_to_hbm [thread:$0]  %s306_s20, 128, %s723_s5, [#allocation4]  }
 0x2a5   :  { %528 = dma.done.wait [#allocation4], 128  }
 0x2a6   :  { %529 = vsyncadd [#allocation4], 4294967168 }
 0x2a7   :  { %312 = vsyncpa [#allocation3], 1 }
 0x2a8   :  { %313 = vsyncpa [#allocation4], 1 }

</bundles_post_ra>
